<compile_context>
chip_gen: v6e
topology: v6e:2x2x1
jax: 0.10.0
libtpu: 0.0.40
codegen_flags: <defaults>
</compile_context>

<pallas_src>
import functools

import jax
import jax.numpy as jnp
from jax import lax
from jax.experimental import pallas as pl
from jax.experimental.pallas import tpu as pltpu


def dis_loss_kernel(x_ref, yt_ref, w1t_ref, b1t_ref, w2_ref, b2_ref,
                    loss_ref, acc_ref, *, n_true, block_n, need_mask, precision):
    i = pl.program_id(0)

    @pl.when(i == 0)
    def _init():
        acc_ref[0] = jnp.float32(0.0)

    # Hidden layer, lane-dense: h^T = tanh(W1^T @ X^T + b1^T) -> (H, TN).
    # X tile stays (TN, F); the transpose is folded into the MXU contraction
    # (contract F of W1^T with F of X), so batch N lands on the 128-lane axis.
    ht = jnp.tanh(
        lax.dot_general(
            w1t_ref[...], x_ref[...],
            dimension_numbers=(((1,), (1,)), ((), ())),
            preferred_element_type=jnp.float32,
            precision=precision,
        )
        + b1t_ref[...]                                   # (H, 1) broadcast over lanes
    )

    # Logit row: z = W2 . h + b2 -> (1, TN).  VPU multiply + sublane (XLU)
    # reduce instead of a degenerate (TN, 1) MXU matmul.
    b2 = b2_ref[0, 0]                                    # scalar from SMEM
    z = jnp.sum(ht * w2_ref[...], axis=0, keepdims=True) + b2

    # Numerically-stable binary cross-entropy with logits (matches PyTorch):
    #   l = max(z, 0) - z*y + log(1 + exp(-|z|))
    yt = yt_ref[...]                                     # (1, TN)
    bce = jnp.maximum(z, 0.0) - z * yt + jnp.log1p(jnp.exp(-jnp.abs(z)))

    if need_mask:
        # Ragged last tile: zero out padded columns before the sum.
        col = i * block_n + lax.broadcasted_iota(jnp.int32, bce.shape, 1)
        bce = jnp.where(col < n_true, bce, 0.0)

    acc_ref[0] += jnp.sum(bce)

    @pl.when(i == pl.num_programs(0) - 1)
    def _finalize():
        loss_ref[0, 0] = acc_ref[0] * jnp.float32(1.0 / n_true)


def dis_forward_loss(x, labels, w1, b1, w2, b2, *, block_n=None,
                     use_bf16_matmul=False):
    """Scalar BCE-with-logits loss (mean over batch), matching DIS.forward."""
    n, f = x.shape
    h = w1.shape[1]

    # Wrapper layout prep.  X is NOT transposed (that extra XLA op + HBM round
    # trip costs as much as the whole kernel at small N); only the tiny weight
    # tensors are reshaped/transposed here.
    x_in = jnp.asarray(x, jnp.float32)                    # (N, F)
    yt = jnp.asarray(labels, jnp.float32).reshape(1, -1)  # (1, N)
    w1t = jnp.asarray(w1, jnp.float32).T                  # (H, F)
    b1t = jnp.asarray(b1, jnp.float32).reshape(h, 1)      # (H, 1)
    w2c = jnp.asarray(w2, jnp.float32).reshape(h, 1)      # (H, 1)
    b2c = jnp.asarray(b2, jnp.float32).reshape(1, 1)      # (1, 1) -> SMEM scalar

    if use_bf16_matmul:
        # v6e/v7x: bf16 MXU operands (fewer vmatmul passes, half the X DMA);
        # accumulation and all activation/BCE math stay f32.
        x_in = x_in.astype(jnp.bfloat16)
        w1t = w1t.astype(jnp.bfloat16)
        precision = None
    else:
        # f32 parity with PyTorch float32 matmul (also the v5e-safe path).
        precision = jax.lax.Precision.HIGHEST

    # N tiling: lane-dense tiles, multiple of 128 (default 512) so BlockSpec
    # double-buffering hides the X DMA and each tile stays tiny vs the scoped
    # VMEM budget (including v7x's 64 MiB physical VMEM).
    if block_n is None:
        block_n = 512
    if n <= block_n or n < 128:
        block_n = n                                  # single full tile (always legal)
    else:
        block_n = max(128, (block_n // 128) * 128)   # lane-dense multiple of 128
    num_tiles = pl.cdiv(n, block_n)
    need_mask = (n % block_n) != 0

    kernel = functools.partial(
        dis_loss_kernel, n_true=n, block_n=block_n,
        need_mask=need_mask, precision=precision)

    cost = pl.CostEstimate(
        flops=2 * n * f * h + 2 * n * h,                 # matmul + matvec-as-reduce
        transcendentals=n * h + 2 * n,                   # tanh + exp/log1p
        bytes_accessed=(x_in.size * x_in.dtype.itemsize
                        + w1t.size * w1t.dtype.itemsize
                        + 4 * (yt.size + b1t.size + w2c.size + b2c.size + 1)),
    )

    # TODO(synk): on v7x, split the N axis across the two TensorCores (per-core
    # partial (sum, count) outputs reduced in the wrapper); here the axis must
    # stay "arbitrary" because the scalar loss output is an accumulator.
    loss = pl.pallas_call(
        kernel,
        out_shape=jax.ShapeDtypeStruct((1, 1), jnp.float32),
        grid=(num_tiles,),
        in_specs=[
            pl.BlockSpec((block_n, f), lambda i: (i, 0)),      # X tile (TN, F)
            pl.BlockSpec((1, block_n), lambda i: (0, i)),      # labels (1, TN)
            pl.BlockSpec(memory_space=pltpu.VMEM),             # W1^T resident
            pl.BlockSpec(memory_space=pltpu.VMEM),             # b1^T resident
            pl.BlockSpec(memory_space=pltpu.VMEM),             # W2 resident
            pl.BlockSpec(memory_space=pltpu.SMEM),             # b2 scalar
        ],
        out_specs=pl.BlockSpec(memory_space=pltpu.SMEM),       # scalar loss
        scratch_shapes=[pltpu.SMEM((1,), jnp.float32)],        # running BCE sum
        compiler_params=pltpu.CompilerParams(
            dimension_semantics=("arbitrary",)),
        cost_estimate=cost,
    )(x_in, yt, w1t, b1t, w2c, b2c)
    return loss[0, 0]


def dis_forward_loss_ref(x, labels, w1, b1, w2, b2):
    """Pure-JAX reference of the PyTorch forward for verification."""
    y = labels.reshape(-1, 1).astype(jnp.float32)
    hp = jnp.dot(x.astype(jnp.float32), w1, precision=jax.lax.Precision.HIGHEST)
    z = jnp.dot(jnp.tanh(hp + b1), w2, precision=jax.lax.Precision.HIGHEST) + b2
    bce = jnp.maximum(z, 0.0) - z * y + jnp.log1p(jnp.exp(-jnp.abs(z)))
    return jnp.mean(bce)


if __name__ == "__main__":
    # Small shapes consistent with the module: batch N, feature dim F, hidden H.
    N, F, H = 256, 64, 32

    key = jax.random.PRNGKey(0)
    kx, ky, kw1, kb1, kw2, kb2 = jax.random.split(key, 6)

    x = jax.random.normal(kx, (N, F), dtype=jnp.float32)
    labels = jax.random.bernoulli(ky, 0.5, (N,)).astype(jnp.float32)

    # Deterministic synthetic parameters (shapes implied by pred_score).
    D_w1 = 0.1 * jax.random.normal(kw1, (F, H), dtype=jnp.float32)
    D_b1 = 0.1 * jax.random.normal(kb1, (1, H), dtype=jnp.float32)
    D_w2 = 0.1 * jax.random.normal(kw2, (H, 1), dtype=jnp.float32)
    D_b2 = 0.1 * jax.random.normal(kb2, (1, 1), dtype=jnp.float32)

    ref = dis_forward_loss_ref(x, labels, D_w1, D_b1, D_w2, D_b2)

    # 1) f32 path (PyTorch float32 parity), single lane-dense tile.
    out = jax.block_until_ready(dis_forward_loss(x, labels, D_w1, D_b1, D_w2, D_b2))
    assert jnp.allclose(out, ref, rtol=1e-5, atol=1e-5), (out, ref)

    # 2) bf16 MXU-operand path (v6e/v7x optimization); activations/BCE stay f32.
    out_bf16 = jax.block_until_ready(
        dis_forward_loss(x, labels, D_w1, D_b1, D_w2, D_b2, use_bf16_matmul=True))
    assert jnp.allclose(out_bf16, ref, rtol=2e-2, atol=2e-2), (out_bf16, ref)

    # 3) Gridded + masked path: ragged N (200) with two lane-dense tiles of 128.
    N2 = 200
    x2, labels2 = x[:N2], labels[:N2]
    ref2 = dis_forward_loss_ref(x2, labels2, D_w1, D_b1, D_w2, D_b2)
    out2 = jax.block_until_ready(
        dis_forward_loss(x2, labels2, D_w1, D_b1, D_w2, D_b2, block_n=128))
    assert jnp.allclose(out2, ref2, rtol=1e-5, atol=1e-5), (out2, ref2)

    print("KERNEL_OK")
</pallas_src>

<mosaic_0001>
module attributes {stable_mosaic.version = 11 : i64} {
  func.func @dis_loss_kernel(%arg0: i32, %arg1: memref<256x64xf32, #tpu.memory_space<vmem>>, %arg2: memref<1x256xf32, #tpu.memory_space<vmem>>, %arg3: memref<32x64xf32, #tpu.memory_space<vmem>>, %arg4: memref<32x1xf32, #tpu.memory_space<vmem>>, %arg5: memref<32x1xf32, #tpu.memory_space<vmem>>, %arg6: memref<1x1xf32, #tpu.memory_space<smem>>, %arg7: memref<1x1xf32, #tpu.memory_space<smem>>, %arg8: memref<1xf32, #tpu.memory_space<smem>>) attributes {dimension_semantics = [#tpu.dimension_semantics<arbitrary>], iteration_bounds = array<i64: 1>, scalar_prefetch = 0 : i64, scratch_operands = 1 : i64, tpu.core_type = #tpu.core_type<tc>, window_params = [{transform_indices = @transform_0, window_bounds = array<i64: 256, 64>}, {transform_indices = @transform_1, window_bounds = array<i64: 1, 256>}, {pipeline_mode = #tpu.pipeline_mode<synchronous>, transform_indices = @transform_2, window_bounds = array<i64: 32, 64>}, {pipeline_mode = #tpu.pipeline_mode<synchronous>, transform_indices = @transform_3, window_bounds = array<i64: 32, 1>}, {pipeline_mode = #tpu.pipeline_mode<synchronous>, transform_indices = @transform_4, window_bounds = array<i64: 32, 1>}, {transform_indices = @transform_5, window_bounds = array<i64: 1, 1>}, {transform_indices = @transform_6, window_bounds = array<i64: 1, 1>}]} {
    %c0_i32 = arith.constant 0 : i32
    %0 = arith.cmpi eq, %arg0, %c0_i32 : i32
    %1 = arith.extui %0 : i1 to i32
    %c0_i32_0 = arith.constant 0 : i32
    %2 = arith.cmpi ne, %1, %c0_i32_0 : i32
    scf.if %2 {
      %cst_20 = arith.constant 0.000000e+00 : f32
      %c0_21 = arith.constant 0 : index
      %39 = memref.load %arg8[%c0_21] : memref<1xf32, #tpu.memory_space<smem>>
      memref.store %cst_20, %arg8[%c0_21] : memref<1xf32, #tpu.memory_space<smem>>
    } else {
    }
    %c0 = arith.constant 0 : index
    %c0_1 = arith.constant 0 : index
    %3 = vector.load %arg3[%c0, %c0_1] : memref<32x64xf32, #tpu.memory_space<vmem>>, vector<32x64xf32>
    %c0_2 = arith.constant 0 : index
    %c0_3 = arith.constant 0 : index
    %4 = vector.load %arg1[%c0_2, %c0_3] : memref<256x64xf32, #tpu.memory_space<vmem>>, vector<256x64xf32>
    %cst = arith.constant dense<0.000000e+00> : vector<32x256xf32>
    %5 = tpu.matmul %3, %4, %cst {dimension_numbers = #tpu.dot_dimension_numbers<[1], [1], [0], [0], [0, 0, 1, 0], [], []>, precision = #tpu.contract_precision<fp32>} : vector<32x64xf32>, vector<256x64xf32>, vector<32x256xf32> -> vector<32x256xf32>
    %c0_4 = arith.constant 0 : index
    %c0_5 = arith.constant 0 : index
    %6 = vector.load %arg4[%c0_4, %c0_5] : memref<32x1xf32, #tpu.memory_space<vmem>>, vector<32x1xf32>
    %7 = vector.broadcast %6 : vector<32x1xf32> to vector<32x256xf32>
    %8 = arith.addf %5, %7 : vector<32x256xf32>
    %9 = math.tanh %8 : vector<32x256xf32>
    %c0_6 = arith.constant 0 : index
    %c0_7 = arith.constant 0 : index
    %10 = memref.load %arg6[%c0_6, %c0_7] : memref<1x1xf32, #tpu.memory_space<smem>>
    %c0_8 = arith.constant 0 : index
    %c0_9 = arith.constant 0 : index
    %11 = vector.load %arg5[%c0_8, %c0_9] : memref<32x1xf32, #tpu.memory_space<vmem>>, vector<32x1xf32>
    %12 = vector.broadcast %11 : vector<32x1xf32> to vector<32x256xf32>
    %13 = arith.mulf %9, %12 : vector<32x256xf32>
    %cst_10 = arith.constant dense<0.000000e+00> : vector<256xf32>
    %14 = vector.multi_reduction <add>, %13, %cst_10 [0] : vector<32x256xf32> to vector<256xf32>
    %15 = vector.shape_cast %14 : vector<256xf32> to vector<1x256xf32>
    %16 = vector.broadcast %10 : f32 to vector<1x256xf32>
    %17 = arith.addf %15, %16 : vector<1x256xf32>
    %c0_11 = arith.constant 0 : index
    %c0_12 = arith.constant 0 : index
    %18 = vector.load %arg2[%c0_11, %c0_12] : memref<1x256xf32, #tpu.memory_space<vmem>>, vector<1x256xf32>
    %cst_13 = arith.constant 0.000000e+00 : f32
    %19 = vector.broadcast %cst_13 : f32 to vector<1x256xf32>
    %20 = arith.maximumf %17, %19 : vector<1x256xf32>
    %21 = arith.mulf %17, %18 : vector<1x256xf32>
    %22 = arith.subf %20, %21 : vector<1x256xf32>
    %23 = math.absf %17 : vector<1x256xf32>
    %cst_14 = arith.constant 0.000000e+00 : f32
    %24 = vector.broadcast %cst_14 : f32 to vector<1x256xf32>
    %25 = arith.subf %24, %23 : vector<1x256xf32>
    %26 = math.exp %25 : vector<1x256xf32>
    %27 = math.log1p %26 : vector<1x256xf32>
    %28 = arith.addf %22, %27 : vector<1x256xf32>
    %c0_15 = arith.constant 0 : index
    %29 = memref.load %arg8[%c0_15] : memref<1xf32, #tpu.memory_space<smem>>
    %30 = vector.shape_cast %28 : vector<1x256xf32> to vector<1x1x256xf32>
    %cst_16 = arith.constant dense<0.000000e+00> : vector<1xf32>
    %31 = vector.multi_reduction <add>, %30, %cst_16 [1, 2] : vector<1x1x256xf32> to vector<1xf32>
    %32 = vector.shape_cast %31 : vector<1xf32> to vector<1x1x1xf32>
    %33 = vector.extract %32[0, 0, 0] : f32 from vector<1x1x1xf32>
    %34 = arith.addf %29, %33 : f32
    %c0_17 = arith.constant 0 : index
    %35 = memref.load %arg8[%c0_17] : memref<1xf32, #tpu.memory_space<smem>>
    memref.store %34, %arg8[%c0_17] : memref<1xf32, #tpu.memory_space<smem>>
    %c0_i32_18 = arith.constant 0 : i32
    %36 = arith.cmpi eq, %arg0, %c0_i32_18 : i32
    %37 = arith.extui %36 : i1 to i32
    %c0_i32_19 = arith.constant 0 : i32
    %38 = arith.cmpi ne, %37, %c0_i32_19 : i32
    scf.if %38 {
      %c0_20 = arith.constant 0 : index
      %39 = memref.load %arg8[%c0_20] : memref<1xf32, #tpu.memory_space<smem>>
      %cst_21 = arith.constant 3.906250e-03 : f32
      %40 = arith.mulf %39, %cst_21 : f32
      %c0_22 = arith.constant 0 : index
      %c0_23 = arith.constant 0 : index
      %41 = memref.load %arg7[%c0_22, %c0_23] : memref<1x1xf32, #tpu.memory_space<smem>>
      memref.store %40, %arg7[%c0_22, %c0_23] : memref<1x1xf32, #tpu.memory_space<smem>>
    } else {
    }
    return
  }
  func.func @transform_0(%arg0: i32) -> (i32, i32) {
    %c0_i32 = arith.constant 0 : i32
    %c0_i32_0 = arith.constant 0 : i32
    return %arg0, %c0_i32 : i32, i32
  }
  func.func @transform_1(%arg0: i32) -> (i32, i32) {
    %c0_i32 = arith.constant 0 : i32
    %c0_i32_0 = arith.constant 0 : i32
    return %c0_i32, %arg0 : i32, i32
  }
  func.func @transform_2(%arg0: i32) -> (i32, i32) {
    %c0_i32 = arith.constant 0 : i32
    %c0_i32_0 = arith.constant 0 : i32
    %c0_i32_1 = arith.constant 0 : i32
    return %c0_i32, %c0_i32_0 : i32, i32
  }
  func.func @transform_3(%arg0: i32) -> (i32, i32) {
    %c0_i32 = arith.constant 0 : i32
    %c0_i32_0 = arith.constant 0 : i32
    %c0_i32_1 = arith.constant 0 : i32
    return %c0_i32, %c0_i32_0 : i32, i32
  }
  func.func @transform_4(%arg0: i32) -> (i32, i32) {
    %c0_i32 = arith.constant 0 : i32
    %c0_i32_0 = arith.constant 0 : i32
    %c0_i32_1 = arith.constant 0 : i32
    return %c0_i32, %c0_i32_0 : i32, i32
  }
  func.func @transform_5(%arg0: i32) -> (i32, i32) {
    %c0_i32 = arith.constant 0 : i32
    %c0_i32_0 = arith.constant 0 : i32
    %c0_i32_1 = arith.constant 0 : i32
    return %c0_i32, %c0_i32_0 : i32, i32
  }
  func.func @transform_6(%arg0: i32) -> (i32, i32) {
    %c0_i32 = arith.constant 0 : i32
    %c0_i32_0 = arith.constant 0 : i32
    %c0_i32_1 = arith.constant 0 : i32
    return %c0_i32, %c0_i32_0 : i32, i32
  }
}

</mosaic_0001>

<bundles_post_ra>
// kernel: tpu_custom_call.1
= control target key start
LH: loop header
LB: loop body
LE: loop exit
PB: predicated region body
PF: predicated region fallthrough
CT: control target
= control target key end

     0   :  { %vm91_vm0 = vcmask 523264   ;;  %s2401_s0 = inlined_call_operand.vmem [shape: f32[256,64], index: 0, kind: input, shape index: {}]   ;;  %s2402_s1 = inlined_call_operand.vmem [shape: f32[1,256], index: 1, kind: input, shape index: {}]   ;;  %s2403_s2 = inlined_call_operand.vmem [shape: f32[32,64], index: 2, kind: input, shape index: {}]   ;;  %s2404_s3 = inlined_call_operand.vmem [shape: f32[32,1], index: 3, kind: input, shape index: {}]   ;;  %s2405_s4 = inlined_call_operand.vmem [shape: f32[32,1], index: 4, kind: input, shape index: {}]   ;;  %s2406_s5 = inlined_call_operand.<no memory space> [shape: f32[1,1], index: 5, kind: input, shape index: {}]   ;;  %s2407_s6 = inlined_call_operand.hbm [shape: f32[1,1], index: 6, kind: output, shape index: {}]  }
   0x1   :  { %v66_v0 = vld [vmem:[%s2401_s0 + $0xf8] sm:$0xff]  ;;  %v65_v2 = vld [vmem:[%s2401_s0 + $0xf0] sm:$0xff]  ;;  %v64_v7 = vld [vmem:[%s2401_s0 + $0xe8] sm:$0xff] }
   0x2   :  { %v50_v1 = vld [vmem:[%s2401_s0 + $0x78] sm:$0xff]  ;;  %v198_v3 = vsel %vm91_vm0, %v66_v0, 0  ;;  %v195_v5 = vsel %vm91_vm0, %v65_v2, 0  ;;  %v49_v6 = vld [vmem:[%s2401_s0 + $0x70] sm:$0xff]  ;;  %v48_v8 = vld [vmem:[%s2401_s0 + $0x68] sm:$0xff]  ;;  %v192_v16 = vsel %vm91_vm0, %v64_v7, 0 }
   0x3   :  { %v150_v4 = vsel %vm91_vm0, %v50_v1, 0  ;;  %v1685_v9 = vand.u32 4294901760, %v198_v3  ;;  %v1689_v11 = vand.u32 4294901760, %v195_v5  ;;  %v147_v12 = vsel %vm91_vm0, %v49_v6, 0  ;;  %v63_v13 = vld [vmem:[%s2401_s0 + $0xe0] sm:$0xff]  ;;  %v62_v19 = vld [vmem:[%s2401_s0 + $0xd8] sm:$0xff] }
   0x4   :  { %v1687_v10 = vand.u32 4294901760, %v150_v4  ;;  %v47_v14 = vld [vmem:[%s2401_s0 + $0x60] sm:$0xff]  ;;  %v1698_v15 = vand.u32 4294901760, %v147_v12  ;;  %v144_v17 = vsel %vm91_vm0, %v48_v8, 0  ;;  %v189_v18 = vsel %vm91_vm0, %v63_v13, 0  ;;  %v46_v27 = vld [vmem:[%s2401_s0 + $0x58] sm:$0xff] }
   0x5   :  { %1347 = vmatprep.subr.mxu0 %v1685_v9  ;;  %v1707_v20 = vand.u32 4294901760, %v192_v16  ;;  %v1710_v21 = vsub.f32 %v198_v3, %v1685_v9  ;;  %v1712_v22 = vand.u32 4294901760, %v144_v17  ;;  %v1719_v24 = vsub.f32 %v195_v5, %v1689_v11  ;;  %v61_v36 = vld [vmem:[%s2401_s0 + $0xd0] sm:$0xff]  ;;  %v60_v50 = vld [vmem:[%s2401_s0 + $0xc8] sm:$0xff]  ;;  %v59_v60 = vld [vmem:[%s2401_s0 + $0xc0] sm:$0xff] }
   0x6   :  { %v1715_v23 = vsub.f32 %v150_v4, %v1687_v10  ;;  %1348 = vmatpush3.xpose.msra.mxu0 %v1687_v10  ;;  %v141_v25 = vsel %vm91_vm0, %v47_v14, 0  ;;  %v1723_v26 = vsub.f32 %v147_v12, %v1698_v15  ;;  %v1731_v30 = vand.u32 4294901760, %v189_v18  ;;  %v45_v45 = vld [vmem:[%s2401_s0 + $0x50] sm:$0xff]  ;;  %v44_v59 = vld [vmem:[%s2401_s0 + $0x48] sm:$0xff] }
   0x7   :  { %1349 = vmatprep.subr.mxu0 %v1689_v11  ;;  %v2424_v28 = vand.u32 4294901760, %v1710_v21  ;;  %v186_v31 = vsel %vm91_vm0, %v62_v19, 0  ;;  %v2421_v32 = vand.u32 4294901760, %v1719_v24  ;;  %v1735_v33 = vand.u32 4294901760, %v141_v25 }
   0x8   :  { %v2423_v29 = vand.u32 4294901760, %v1715_v23  ;;  %v2420_v34 = vand.u32 4294901760, %v1723_v26  ;;  %v1739_v35 = vsub.f32 %v192_v16, %v1707_v20  ;;  %v138_v39 = vsel %vm91_vm0, %v46_v27, 0 }
   0x9   :  { %v457_v37 = vsub.f32 %v1710_v21, %v2424_v28  ;;  %v1752_v40 = vsub.f32 %v144_v17, %v1712_v22  ;;  %v464_v41 = vsub.f32 %v1719_v24, %v2421_v32  ;;  %v1761_v43 = vand.u32 4294901760, %v186_v31 }
   0xa   :  { %v345_v38 = vsub.f32 %v1715_v23, %v2423_v29  ;;  %1350 = vmatpush3.xpose.msra.mxu0 %v1698_v15  ;;  %v352_v42 = vsub.f32 %v1723_v26, %v2420_v34  ;;  %v2419_v44 = vand.u32 4294901760, %v1739_v35  ;;  %v183_v49 = vsel %vm91_vm0, %v61_v36, 0 }
   0xb   :  { %1351 = vmatprep.subr.mxu0 %v1707_v20  ;;  %v458_v46 = vand.u32 4294901760, %v457_v37  ;;  %v2417_v48 = vand.u32 4294901760, %v1752_v40  ;;  %v465_v51 = vand.u32 4294901760, %v464_v41  ;;  %v1776_v54 = vand.u32 4294901760, %v138_v39 }
   0xc   :  { %v346_v47 = vand.u32 4294901760, %v345_v38  ;;  %v353_v52 = vand.u32 4294901760, %v352_v42  ;;  %v471_v53 = vsub.f32 %v1739_v35, %v2419_v44  ;;  %v1782_v56 = vsub.f32 %v189_v18, %v1731_v30 }
   0xd   :  { %1387 = vmatprep.subr.mxu1 %v458_v46  ;;  %v359_v55 = vsub.f32 %v1752_v40, %v2417_v48  ;;  %v135_v57 = vsel %vm91_vm0, %v45_v45, 0  ;;  %v1786_v58 = vsub.f32 %v141_v25, %v1735_v33  ;;  %v1795_v62 = vand.u32 4294901760, %v183_v49 }
   0xe   :  { %1352 = vmatpush3.xpose.msra.mxu0 %v1712_v22  ;;  %1388 = vmatpush3.xpose.msra.mxu1 %v346_v47  ;;  %v472_v61 = vand.u32 4294901760, %v471_v53  ;;  %v180_v63 = vsel %vm91_vm0, %v60_v50, 0  ;;  %v1799_v0 = vsub.f32 %v186_v31, %v1761_v43 }
   0xf   :  { %12 = vsyncpa [#allocation5], 0  ;;  %1353 = vmatprep.subr.mxu0 %v1731_v30  ;;  %1389 = vmatprep.subr.mxu1 %v465_v51  ;;  %v360_v1 = vand.u32 4294901760, %v359_v55  ;;  %v2416_v2 = vand.u32 4294901760, %v1782_v56  ;;  %v1803_v3 = vand.u32 4294901760, %v135_v57  ;;  %v2414_v4 = vand.u32 4294901760, %v1786_v58 }
  0x10   :  { %v43_v5 = vld [vmem:[%s2401_s0 + $0x40] sm:$0xff]  ;;  %v2412_v6 = vand.u32 4294901760, %v1799_v0  ;;  %v132_v7 = vsel %vm91_vm0, %v44_v59, 0  ;;  %v1812_v8 = vsub.f32 %v138_v39, %v1776_v54  ;;  %v177_v12 = vsel %vm91_vm0, %v59_v60, 0  ;;  %v58_v18 = vld [vmem:[%s2401_s0 + $0xb8] sm:$0xff]  ;;  %v57_v46 = vld [vmem:[%s2401_s0 + $0xb0] sm:$0xff] }
  0x11   :  { %v478_v13 = vsub.f32 %v1782_v56, %v2416_v2  ;;  %v366_v14 = vsub.f32 %v1786_v58, %v2414_v4  ;;  %v1821_v16 = vand.u32 4294901760, %v180_v63  ;;  %v1823_v17 = vand.u32 4294901760, %v132_v7  ;;  %v42_v45 = vld [vmem:[%s2401_s0 + $0x38] sm:$0xff]  ;;  %v41_v59 = vld [vmem:[%s2401_s0 + $0x30] sm:$0xff]  ;;  %s1628_s13 = smov [#allocation4]  }
  0x12   :  { %1354 = vmatpush3.xpose.msra.mxu0 %v1735_v33  ;;  %1390 = vmatpush3.xpose.msra.mxu1 %v353_v52  ;;  %v485_v19 = vsub.f32 %v1799_v0, %v2412_v6  ;;  %v2411_v25 = vand.u32 4294901760, %v1812_v8  ;;  %v1834_v27 = vsub.f32 %v183_v49, %v1795_v62  ;;  %v129_v31 = vsel %vm91_vm0, %v43_v5, 0  ;;  %v56_v5 = vld [vmem:[%s2401_s0 + $0xa8] sm:$0xff]  ;;  %v38_v32 = vld [vmem:[%s2401_s0 + $0x18] sm:$0xff] }
  0x13   :  { %2489 = vst [vmem:[#allocation7_spill] sm:$0xff] %v1823_v17  ;;  %1355 = vmatprep.subr.mxu0 %v1761_v43  ;;  %1391 = vmatprep.subr.mxu1 %v472_v61  ;;  %v479_v36 = vand.u32 4294901760, %v478_v13  ;;  %v1838_v37 = vand.u32 4294901760, %v177_v12  ;;  %v1841_v38 = vsub.f32 %v135_v57, %v1803_v3  ;;  %v367_v39 = vand.u32 4294901760, %v366_v14 }
  0x14   :  { %v2409_v41 = vand.u32 4294901760, %v1834_v27  ;;  %v174_v42 = vsel %vm91_vm0, %v58_v18, 0  ;;  %v373_v47 = vsub.f32 %v1812_v8, %v2411_v25  ;;  %v1854_v49 = vand.u32 4294901760, %v129_v31 }
  0x15   :  { %2490 = vst [vmem:[#allocation8_spill] sm:$0xff] %v1838_v37  ;;  %v2408_v50 = vand.u32 4294901760, %v1841_v38  ;;  %v1858_v51 = vsub.f32 %v180_v63, %v1821_v16  ;;  %v486_v52 = vand.u32 4294901760, %v485_v19  ;;  %v1864_v55 = vand.u32 4294901760, %v174_v42 }
  0x16   :  { %2491 = vst [vmem:[#allocation9_spill] sm:$0xff] %v1854_v49  ;;  %1356 = vmatpush3.xpose.msra.mxu0 %v1776_v54  ;;  %1392 = vmatpush3.xpose.msra.mxu1 %v360_v1  ;;  %v492_v53 = vsub.f32 %v1834_v27, %v2409_v41  ;;  %v1867_v57 = vsub.f32 %v132_v7, %v1823_v17  ;;  %v126_v61 = vsel %vm91_vm0, %v42_v45, 0  ;;  %v171_v63 = vsel %vm91_vm0, %v57_v46, 0  ;;  %v40_v46 = vld [vmem:[%s2401_s0 + $0x28] sm:$0xff] }
  0x17   :  { %2492 = vst [vmem:[#allocation10_spill] sm:$0xff] %v1864_v55  ;;  %1357 = vmatprep.subr.mxu0 %v1795_v62  ;;  %1393 = vmatprep.subr.mxu1 %v479_v36  ;;  %v2410_v60 = vand.u32 4294901760, %v1858_v51  ;;  %v1877_v1 = vsub.f32 %v177_v12, %v1838_v37  ;;  %v374_v7 = vand.u32 4294901760, %v373_v47  ;;  %v380_v13 = vsub.f32 %v1841_v38, %v2408_v50 }
  0x18   :  { %v2413_v14 = vand.u32 4294901760, %v1867_v57  ;;  %v123_v18 = vsel %vm91_vm0, %v41_v59, 0  ;;  %v493_v19 = vand.u32 4294901760, %v492_v53  ;;  %v1888_v36 = vand.u32 4294901760, %v126_v61 }
  0x19   :  { %v1890_v12 = vand.u32 4294901760, %v171_v63  ;;  %v1893_v45 = vsub.f32 %v129_v31, %v1854_v49  ;;  %v499_v47 = vsub.f32 %v1858_v51, %v2410_v60  ;;  %v168_v53 = vsel %vm91_vm0, %v56_v5, 0  ;;  %v55_v31 = vld [vmem:[%s2401_s0 + $0xa0] sm:$0xff] }
  0x1a   :  { %1358 = vmatpush3.xpose.msra.mxu0 %v1803_v3  ;;  %1394 = vmatpush3.xpose.msra.mxu1 %v367_v39  ;;  %2493 = vst [vmem:[#allocation11_spill] sm:$0xff] %v1888_v36  ;;  %v2415_v39 = vand.u32 4294901760, %v1877_v1  ;;  %v1905_v59 = vsub.f32 %v174_v42, %v1864_v55  ;;  %v1910_v50 = vand.u32 4294901760, %v123_v18  ;;  %v381_v41 = vand.u32 4294901760, %v380_v13 }
  0x1b   :  { %2494 = vst [vmem:[#allocation12_spill] sm:$0xff] %v1890_v12  ;;  %1359 = vmatprep.subr.mxu0 %v1821_v16  ;;  %1395 = vmatprep.subr.mxu1 %v486_v52  ;;  %v387_v52 = vsub.f32 %v1867_v57, %v2413_v14  ;;  %v2418_v60 = vand.u32 4294901760, %v1893_v45  ;;  %v120_v25 = vsel %vm91_vm0, %v40_v46, 0  ;;  %v1918_v42 = vand.u32 4294901760, %v168_v53 }
  0x1c   :  { %2495 = vst [vmem:[#allocation13_spill] sm:$0xff] %v1910_v50  ;;  %v1921_v5 = vsub.f32 %v126_v61, %v1888_v36  ;;  %v165_v6 = vsel %vm91_vm0, %v55_v31, 0  ;;  %v1925_v13 = vsub.f32 %v171_v63, %v1890_v12  ;;  %v500_v14 = vand.u32 4294901760, %v499_v47  ;;  %v39_v61 = vld [vmem:[%s2401_s0 + $0x20] sm:$0xff] }
  0x1d   :  { %2496 = vst [vmem:[#allocation14_spill] sm:$0xff] %v1918_v42  ;;  %v506_v46 = vsub.f32 %v1877_v1, %v2415_v39  ;;  %v1935_v4 = vand.u32 4294901760, %v120_v25  ;;  %v1938_v31 = vsub.f32 %v123_v18, %v1910_v50  ;;  %v388_v63 = vand.u32 4294901760, %v387_v52  ;;  %v54_v39 = vld [vmem:[%s2401_s0 + $0x98] sm:$0xff] }
  0x1e   :  { %1360 = vmatpush3.xpose.msra.mxu0 %v1823_v17  ;;  %1396 = vmatpush3.xpose.msra.mxu1 %v374_v7  ;;  %2497 = vst [vmem:[#allocation15_spill] sm:$0xff] %v1925_v13  ;;  %v2422_v7 = vand.u32 4294901760, %v1905_v59  ;;  %v1943_v47 = vand.u32 4294901760, %v165_v6  ;;  %v2425_v2 = vand.u32 4294901760, %v1921_v5  ;;  %v2428_v48 = vand.u32 4294901760, %v1925_v13 }
  0x1f   :  { %1361 = vmatprep.subr.mxu0 %v1838_v37  ;;  %1397 = vmatprep.subr.mxu1 %v493_v19  ;;  %2498 = vst [vmem:[#allocation16_spill] sm:$0xff] %v1935_v4  ;;  %2499 = vst [vmem:[#allocation17_spill] sm:$0xff] %v1938_v31  ;;  %v394_v19 = vsub.f32 %v1893_v45, %v2418_v60  ;;  %v117_v18 = vsel %vm91_vm0, %v39_v61, 0  ;;  %v1953_v52 = vsub.f32 %v168_v53, %v1918_v42  ;;  %vm1311_vm3 = vcmask 1040384  }
  0x20   :  { %2500 = vst [vmem:[#allocation18_spill] sm:$0xff] %v1943_v47  ;;  %v507_v60 = vand.u32 4294901760, %v506_v46  ;;  %v513_v44 = vsub.f32 %v1905_v59, %v2422_v7  ;;  %v1965_v61 = vsub.f32 %v120_v25, %v1935_v4  ;;  %v1967_v53 = vand.u32 4294901760, %v117_v18 }
  0x21   :  { %2501 = vst [vmem:[#allocation19_spill] sm:$0xff] %v1953_v52  ;;  %v1973_v46 = vsub.f32 %v165_v6, %v1943_v47  ;;  %v401_v7 = vsub.f32 %v1921_v5, %v2425_v2  ;;  %v520_v25 = vsub.f32 %v1925_v13, %v2428_v48  ;;  %v2435_v29 = vand.u32 4294901760, %v1953_v52  ;;  %v37_v48 = vld [vmem:[%s2401_s0 + $0x10] sm:$0xff] }
  0x22   :  { %1362 = vmatpush3.xpose.msra.mxu0 %v1854_v49  ;;  %1398 = vmatpush3.xpose.msra.mxu1 %v381_v41  ;;  %v162_v41 = vsel %vm91_vm0, %v54_v39, 0  ;;  %2502 = vst [vmem:[#allocation20_spill] sm:$0xff] %v1965_v61  ;;  %2503 = vst [vmem:[#allocation21_spill] sm:$0xff] %v1967_v53  ;;  %v395_v39 = vand.u32 4294901760, %v394_v19  ;;  %v514_v28 = vand.u32 4294901760, %v513_v44  ;;  %v114_v34 = vsel %vm91_vm0, %v38_v32, 0 }
  0x23   :  { %1363 = vmatprep.subr.mxu0 %v1864_v55  ;;  %1399 = vmatprep.subr.mxu1 %v500_v14  ;;  %v53_v14 = vld [vmem:[%s2401_s0 + $0x90] sm:$0xff]  ;;  %2504 = vst [vmem:[#allocation22_spill] sm:$0xff] %v1973_v46  ;;  %v1984_v6 = vand.u32 4294901760, %v162_v41  ;;  %v52_v44 = vld [vmem:[%s2401_s0 + $0x88] sm:$0xff]  ;;  %v2000_v32 = vsub.f32 %v117_v18, %v1967_v53  ;;  %v521_v2 = vand.u32 4294901760, %v520_v25  ;;  %v2009_v55 = vand.u32 4294901760, %v114_v34 }
  0x24   :  { %v36_v18 = vld [vmem:[%s2401_s0 + $0x8] sm:$0xff]  ;;  %v51_v49 = vld [vmem:[%s2401_s0 + $0x80] sm:$0xff] }
  0x25   :  { %2505 = vst [vmem:[#allocation23_spill] sm:$0xff] %v1984_v6  ;;  %2507 = vst [vmem:[#allocation24_spill] sm:$0xff] %v2000_v32 }
  0x26   :  { %1364 = vmatpush3.xpose.msra.mxu0 %v1888_v36  ;;  %1400 = vmatpush3.xpose.msra.mxu1 %v388_v63  ;;  %v2506_v63 = vand.u32 4294901760, %v1938_v31  ;;  %v159_v36 = vsel %vm91_vm0, %v53_v14, 0  ;;  %v402_v14 = vand.u32 4294901760, %v401_v7  ;;  %2508 = vst [vmem:[#allocation25_spill] sm:$0xff] %v2009_v55  ;;  %v156_v7 = vsel %vm91_vm0, %v52_v44, 0 }
  0x27   :  { %1365 = vmatprep.subr.mxu0 %v1890_v12  ;;  %1401 = vmatprep.subr.mxu1 %v507_v60  ;;  %v527_v12 = vsub.f32 %v1953_v52, %v2435_v29  ;;  %v2015_v60 = vand.u32 4294901760, %v159_v36  ;;  %v2511_v29 = vand.u32 4294901760, %v1965_v61  ;;  %v153_v44 = vsel %vm91_vm0, %v51_v49, 0 }
  0x28   :  { %v408_v19 = vsub.f32 %v1938_v31, %v2506_v63  ;;  %v31_v63 = vld [vmem:[%s2403_s2] sm:$0xff] }
  0x29   :  { %2509 = vst [vmem:[#allocation26_spill] sm:$0xff] %v2015_v60  ;;  %v415_v52 = vsub.f32 %v1965_v61, %v2511_v29  ;;  %v528_v29 = vand.u32 4294901760, %v527_v12  ;;  %v2039_v61 = vand.u32 4294901760, %v156_v7  ;;  %v2051_v12 = vsub.f32 %v159_v36, %v2015_v60 }
  0x2a   :  { %1366 = vmatpush3.xpose.msra.mxu0 %v1910_v50  ;;  %1402 = vmatpush3.xpose.msra.mxu1 %v395_v39  ;;  %v111_v50 = vsel %vm91_vm0, %v37_v48, 0  ;;  %v2020_v39 = vsub.f32 %v162_v41, %v1984_v6  ;;  %v409_v25 = vand.u32 4294901760, %v408_v19  ;;  %v108_v41 = vsel %vm91_vm0, %v36_v18, 0 }
  0x2b   :  { %1367 = vmatprep.subr.mxu0 %v1918_v42  ;;  %1403 = vmatprep.subr.mxu1 %v514_v28  ;;  %v93_v28 = vsel %vm91_vm0, %v31_v63, 0  ;;  %v2512_v42 = vand.u32 4294901760, %v1973_v46  ;;  %v2037_v19 = vand.u32 4294901760, %v111_v50  ;;  %2514 = vst [vmem:[#allocation29_spill] sm:$0xff] %v2039_v61  ;;  %v2042_v63 = vsub.f32 %v114_v34, %v2009_v55  ;;  %2516 = vst [vmem:[#allocation31_spill] sm:$0xff] %v2051_v12 }
  0x2c   :  { %2510 = vst [vmem:[#allocation27_spill] sm:$0xff] %v2020_v39  ;;  %v2034_v31 = vand.u32 4294901760, %v93_v28  ;;  %v2517_v18 = vand.u32 4294901760, %v2000_v32 }
  0x2d   :  { %v534_v48 = vsub.f32 %v1973_v46, %v2512_v42  ;;  %2513 = vst [vmem:[#allocation28_spill] sm:$0xff] %v2037_v19  ;;  %2515 = vst [vmem:[#allocation30_spill] sm:$0xff] %v2042_v63  ;;  %v32_v42 = vld [vmem:[%s2403_s2 + $0x8] sm:$0xff]  ;;  %v2059_v46 = vand.u32 4294901760, %v108_v41 }
  0x2e   :  { %1368 = vmatpush3.xpose.msra.mxu0 %v1935_v4  ;;  %1404 = vmatpush3.xpose.msra.mxu1 %v402_v14  ;;  %v35_v14 = vld [vmem:[%s2401_s0] sm:$0xff]  ;;  %v2057_v34 = vsub.f32 %v93_v28, %v2034_v31  ;;  %v416_v4 = vand.u32 4294901760, %v415_v52  ;;  %v422_v49 = vsub.f32 %v2000_v32, %v2517_v18  ;;  %v2071_v52 = vand.u32 4294901760, %v153_v44  ;;  %v33_v18 = vld [vmem:[%s2403_s2 + $0x10] sm:$0xff] }
  0x2f   :  { %1369 = vmatprep.subr.mxu0 %v1943_v47  ;;  %1405 = vmatprep.subr.mxu1 %v521_v2  ;;  %v535_v2 = vand.u32 4294901760, %v534_v48  ;;  %v96_v47 = vsel %vm91_vm0, %v32_v42, 0  ;;  %v105_v37 = vsel %vm91_vm0, %v35_v14, 0  ;;  %v2075_v48 = vsub.f32 %v111_v50, %v2037_v19 }
  0x30   :  { %1419 = vmatprep.mubr.f32.mxu1 %v2034_v31  ;;  %v2066_v36 = vand.u32 4294901760, %v2057_v34  ;;  %v2518_v42 = vand.u32 4294901760, %v2020_v39  ;;  %v2088_v14 = vsub.f32 %v156_v7, %v2039_v61  ;;  %v2090_v50 = vand.u32 4294901760, %v96_v47 }
  0x31   :  { %v423_v32 = vand.u32 4294901760, %v422_v49  ;;  %v99_v17 = vsel %vm91_vm0, %v33_v18, 0  ;;  %v2100_v28 = vand.u32 4294901760, %v105_v37  ;;  %v2104_v49 = vsub.f32 %v108_v41, %v2059_v46  ;;  %v34_v18 = vld [vmem:[%s2403_s2 + $0x18] sm:$0xff] }
  0x32   :  { %1370 = vmatpush3.xpose.msra.mxu0 %v1967_v53  ;;  %1406 = vmatpush3.xpose.msra.mxu1 %v409_v25  ;;  %v541_v25 = vsub.f32 %v2020_v39, %v2518_v42  ;;  %v300_v53 = vsub.f32 %v2057_v34, %v2066_v36  ;;  %2519 = vst [vmem:[#allocation32_spill] sm:$0xff] %v2090_v50  ;;  %v2520_v42 = vand.u32 4294901760, %v2042_v63 }
  0x33   :  { %1371 = vmatprep.subr.mxu0 %v1984_v6  ;;  %1407 = vmatprep.subr.mxu1 %v528_v29  ;;  %v1627_v6 = vmov 0   ;;  %v67_v29 = vld [vmem:[%s2404_s3] sm:$0xff]  ;;  %2521 = vst [vmem:[#allocation33_spill] sm:$0xff] %v2100_v28  ;;  %2522 = vst [vmem:[#allocation34_spill] sm:$0xff] %v2104_v49  ;;  %v2118_v41 = vsub.f32 %v96_v47, %v2090_v50 }
  0x34   :  { %v301_v13 = vand.u32 4294901760, %v300_v53  ;;  %1591 = vset.pattern.permute.xlu0 %v1627_v6  ;;  %1592 = vset.pattern.permute.xlu1 %v1627_v6  ;;  %v429_v7 = vsub.f32 %v2042_v63, %v2520_v42  ;;  %v542_v6 = vand.u32 4294901760, %v541_v25  ;;  %v2115_v63 = vsub.f32 %v153_v44, %v2071_v52 }
  0x35   :  { %v2120_v53 = vand.u32 4294901760, %v99_v17  ;;  %73 = vperm.xlu0 %1591, %v67_v29   ;;  %v2525_v25 = vand.u32 4294901760, %v2075_v48  ;;  %v2129_v42 = vsub.f32 %v105_v37, %v2100_v28  ;;  %v2527_v29 = vand.u32 4294901760, %v2088_v14 }
  0x36   :  { %1372 = vmatpush3.xpose.msra.mxu0 %v2009_v55  ;;  %1408 = vmatpush3.xpose.msra.mxu1 %v416_v4  ;;  %v2523_v4 = vand.u32 4294901760, %v2051_v12 }
  0x37   :  { %1373 = vmatprep.subr.mxu0 %v2015_v60  ;;  %1409 = vmatprep.subr.mxu1 %v535_v2  ;;  %2524 = vst [vmem:[#allocation35_spill] sm:$0xff] %v2120_v53  ;;  %v102_v60 = vsel %vm91_vm0, %v34_v18, 0  ;;  %v430_v2 = vand.u32 4294901760, %v429_v7  ;;  %2526 = vst [vmem:[#allocation36_spill] sm:$0xff] %v2129_v42  ;;  %v555_v18 = vsub.f32 %v2088_v14, %v2527_v29  ;;  %v2137_v7 = vand.u32 4294901760, %v2118_v41 }
  0x38   :  { %v548_v55 = vsub.f32 %v2051_v12, %v2523_v4  ;;  %1379 = vmatprep.mubr.f32.mxu0 %v301_v13  ;;  %v436_v4 = vsub.f32 %v2075_v48, %v2525_v25  ;;  %v2140_v25 = vsub.f32 %v99_v17, %v2120_v53  ;;  %v2142_v44 = vand.u32 4294901760, %v102_v60 }
  0x39   :  { %2528 = vst [vmem:[#allocation37_spill] sm:$0xff] %v2137_v7  ;;  %v2478_v29 = vand.u32 4294901760, %v2129_v42 }
  0x3a   :  { %1374 = vmatpush3.xpose.msra.mxu0 %v2037_v19  ;;  %1410 = vmatpush3.xpose.msra.mxu1 %v423_v32  ;;  %v549_v47 = vand.u32 4294901760, %v548_v55  ;;  %2529 = vst [vmem:[#allocation38_spill] sm:$0xff] %v2142_v44  ;;  %v437_v37 = vand.u32 4294901760, %v436_v4  ;;  %v2530_v55 = vand.u32 4294901760, %v2104_v49  ;;  %v556_v32 = vand.u32 4294901760, %v555_v18 }
  0x3b   :  { %1375 = vmatprep.subr.mxu0 %v2039_v61  ;;  %1411 = vmatprep.subr.mxu1 %v542_v6  ;;  %v2531_v61 = vand.u32 4294901760, %v2115_v63  ;;  %v311_v19 = vsub.f32 %v2118_v41, %v2137_v7  ;;  %v2159_v4 = vsub.f32 %v102_v60, %v2142_v44 }
  0x3c   :  { %v443_v6 = vsub.f32 %v2104_v49, %v2530_v55 }
  0x3d   :  { %v562_v17 = vsub.f32 %v2115_v63, %v2531_v61  ;;  %v68_v61 = vld [vmem:[%s2404_s3 + $0x8] sm:$0xff]  ;;  %v312_v7 = vand.u32 4294901760, %v311_v19 }
  0x3e   :  { %1376 = vmatpush3.xpose.msra.mxu0 %v2059_v46  ;;  %1412 = vmatpush3.xpose.msra.mxu1 %v430_v2  ;;  %v2156_v2 = vand.u32 4294901760, %v2140_v25  ;;  %v444_v55 = vand.u32 4294901760, %v443_v6 }
  0x3f   :  { %1377 = vmatprep.subr.mxu0 %v2071_v52  ;;  %1413 = vmatprep.subr.mxu1 %v549_v47  ;;  %v450_v47 = vsub.f32 %v2129_v42, %v2478_v29  ;;  %v563_v18 = vand.u32 4294901760, %v562_v17  ;;  %v2544_v29 = vld [vmem:[#allocation13_spill] sm:$0xff] }
  0x40   :  { %v322_v60 = vsub.f32 %v2140_v25, %v2156_v2  ;;  %78 = vperm.xlu0 %1591, %v68_v61   ;;  %v2534_v61 = vld [vmem:[#allocation8_spill] sm:$0xff] }
  0x42   :  { %1378 = vmatpush3.xpose.msra.mxu0 %v2100_v28  ;;  %1414 = vmatpush3.xpose.msra.mxu1 %v437_v37  ;;  %v2172_v28 = vand.u32 4294901760, %v2159_v4  ;;  %v451_v37 = vand.u32 4294901760, %v450_v47  ;;  %v323_v19 = vand.u32 4294901760, %v322_v60  ;;  %v2533_v47 = vld [vmem:[#allocation15_spill] sm:$0xff]  ;;  %v2536_v60 = vld [vmem:[#allocation9_spill] sm:$0xff] }
  0x43   :  { %1415 = vmatprep.subr.mxu1 %v556_v32  ;;  %1427 = vmatprep.subr.mxu0 %v1710_v21  ;;  %v69_v32 = vld [vmem:[%s2404_s3 + $0x10] sm:$0xff] }
  0x44   :  { %v333_v6 = vsub.f32 %v2159_v4, %v2172_v28  ;;  %83 = vperm.xlu1 %1592, %v69_v32   ;;  %v2538_v32 = vld [vmem:[#allocation10_spill] sm:$0xff] }
  0x45   :  { %1380 = vmatmul.mubr.f32.vlgmr.msra.gmra.mxu0 %v301_v13  ;;  %v70_v13 = vld [vmem:[%s2404_s3 + $0x18] sm:$0xff] }
  0x46   :  { %1416 = vmatpush3.xpose.msra.mxu1 %v444_v55  ;;  %1428 = vmatpush3.xpose.msra.mxu0 %v1715_v23  ;;  %v334_v17 = vand.u32 4294901760, %v333_v6  ;;  %v2532_v55 = vld [vmem:[#allocation7_spill] sm:$0xff] }
  0x47   :  { %1417 = vmatprep.subr.mxu1 %v563_v18  ;;  %1429 = vmatprep.subr.mxu0 %v1719_v24  ;;  %v2535_v18 = vld [vmem:[#allocation17_spill] sm:$0xff]  ;;  %v2540_v6 = vld [vmem:[#allocation11_spill] sm:$0xff] }
  0x48   :  { %1381 = vmatprep.mubr.f32.mxu0 %v312_v7  ;;  %88 = vperm.xlu1 %1592, %v70_v13   ;;  %v2541_v13 = vld [vmem:[#allocation22_spill] sm:$0xff] }
  0x49   :  { %1382 = vmatmul.mubr.f32.gmra.mxu0 %v312_v7  ;;  %v1211_v7 = vld [vmem:[%s2405_s4] sm:$0xff] }
  0x4a   :  { %1418 = vmatpush3.xpose.msra.mxu1 %v451_v37  ;;  %1430 = vmatpush3.xpose.msra.mxu0 %v1723_v26  ;;  %v2537_v37 = vld [vmem:[#allocation19_spill] sm:$0xff] }
  0x4b   :  { %1431 = vmatprep.subr.mxu0 %v1739_v35  ;;  %1467 = vmatprep.subr.mxu1 %v1685_v9 }
  0x4c   :  { %1383 = vmatprep.mubr.f32.mxu0 %v323_v19  ;;  %1217 = vperm.xlu0 %1591, %v1211_v7   ;;  %v2543_v7 = vld [vmem:[#allocation24_spill] sm:$0xff] }
  0x4d   :  { %1420 = vmatmul.mubr.f32.vlgmr.msra.gmra.mxu1 %v2034_v31  ;;  %1384 = vmatmul.mubr.f32.gmra.mxu0 %v323_v19  ;;  %v2539_v19 = vld [vmem:[#allocation20_spill] sm:$0xff] }
  0x4e   :  { %1432 = vmatpush3.xpose.msra.mxu0 %v1752_v40  ;;  %1468 = vmatpush3.xpose.msra.mxu1 %v1687_v10 }
  0x4f   :  { %1433 = vmatprep.subr.mxu0 %v1782_v56  ;;  %1469 = vmatprep.subr.mxu1 %v1689_v11 }
  0x50   :  { %1421 = vmatprep.mubr.f32.mxu1 %v2090_v50  ;;  %1385 = vmatprep.mubr.f32.mxu0 %v334_v17 }
  0x51   :  { %1422 = vmatmul.mubr.f32.gmra.mxu1 %v2090_v50  ;;  %1386 = vmatmul.mubr.f32.gmra.mxu0 %v334_v17  ;;  %v2542_v17 = vld [vmem:[#allocation12_spill] sm:$0xff] }
  0x52   :  { %1434 = vmatpush3.xpose.msra.mxu0 %v1786_v58  ;;  %1470 = vmatpush3.xpose.msra.mxu1 %v1698_v15  ;;  %v2547_v50 = vld [vmem:[#allocation16_spill] sm:$0xff] }
  0x53   :  { %1435 = vmatprep.subr.mxu0 %v1799_v0  ;;  %1471 = vmatprep.subr.mxu1 %v1707_v20 }
  0x54   :  { %1423 = vmatprep.mubr.f32.mxu1 %v2120_v53  ;;  %1459 = vmatprep.mubr.f32.mxu0 %v2057_v34 }
  0x55   :  { %1424 = vmatmul.mubr.f32.gmra.mxu1 %v2120_v53  ;;  %v2546_v53 = vld [vmem:[#allocation30_spill] sm:$0xff] }
  0x56   :  { %1436 = vmatpush3.xpose.msra.mxu0 %v1812_v8  ;;  %1472 = vmatpush3.xpose.msra.mxu1 %v1712_v22 }
  0x57   :  { %1437 = vmatprep.subr.mxu0 %v1834_v27  ;;  %1473 = vmatprep.subr.mxu1 %v1731_v30 }
  0x58   :  { %1425 = vmatprep.mubr.f32.mxu1 %v2142_v44 }
  0x59   :  { %1426 = vmatmul.mubr.f32.gmra.mxu1 %v2142_v44  ;;  %v2545_v44 = vld [vmem:[#allocation14_spill] sm:$0xff] }
  0x5a   :  { %1438 = vmatpush3.xpose.msra.mxu0 %v1841_v38  ;;  %1474 = vmatpush3.xpose.msra.mxu1 %v1735_v33 }
  0x5b   :  { %1439 = vmatprep.subr.mxu0 %v1858_v51  ;;  %1475 = vmatprep.subr.mxu1 %v1761_v43 }
  0x5c   :  { %1499 = vmatprep.mubr.f32.mxu1 %v2066_v36 }
  0x5e   :  { %1440 = vmatpush3.xpose.msra.mxu0 %v1867_v57  ;;  %1476 = vmatpush3.xpose.msra.mxu1 %v1776_v54 }
  0x5f   :  { %1441 = vmatprep.subr.mxu0 %v1877_v1  ;;  %1477 = vmatprep.subr.mxu1 %v1795_v62 }
  0x62   :  { %1442 = vmatpush3.xpose.msra.mxu0 %v1893_v45  ;;  %1478 = vmatpush3.xpose.msra.mxu1 %v1803_v3 }
  0x63   :  { %1443 = vmatprep.subr.mxu0 %v1905_v59  ;;  %1479 = vmatprep.subr.mxu1 %v1821_v16 }
  0x66   :  { %1444 = vmatpush3.xpose.msra.mxu0 %v1921_v5  ;;  %1480 = vmatpush3.xpose.msra.mxu1 %v2532_v55 }
  0x67   :  { %1445 = vmatprep.subr.mxu0 %v2533_v47  ;;  %1481 = vmatprep.subr.mxu1 %v2534_v61 }
  0x6a   :  { %1446 = vmatpush3.xpose.msra.mxu0 %v2535_v18  ;;  %1482 = vmatpush3.xpose.msra.mxu1 %v2536_v60 }
  0x6b   :  { %1447 = vmatprep.subr.mxu0 %v2537_v37  ;;  %1483 = vmatprep.subr.mxu1 %v2538_v32 }
  0x6e   :  { %1448 = vmatpush3.xpose.msra.mxu0 %v2539_v19  ;;  %1484 = vmatpush3.xpose.msra.mxu1 %v2540_v6  ;;  %v2548_v19 = vld [vmem:[#allocation18_spill] sm:$0xff] }
  0x6f   :  { %1449 = vmatprep.subr.mxu0 %v2541_v13  ;;  %1485 = vmatprep.subr.mxu1 %v2542_v17  ;;  %v2549_v13 = vld [vmem:[#allocation21_spill] sm:$0xff] }
  0x72   :  { %1450 = vmatpush3.xpose.msra.mxu0 %v2543_v7  ;;  %1486 = vmatpush3.xpose.msra.mxu1 %v2544_v29  ;;  %v2550_v7 = vld [vmem:[#allocation23_spill] sm:$0xff] }
  0x73   :  { %1451 = vmatprep.subr.mxu0 %v2020_v39  ;;  %1487 = vmatprep.subr.mxu1 %v2545_v44  ;;  %v2551_v39 = vld [vmem:[#allocation25_spill] sm:$0xff] }
  0x76   :  { %1452 = vmatpush3.xpose.msra.mxu0 %v2546_v53  ;;  %1488 = vmatpush3.xpose.msra.mxu1 %v2547_v50  ;;  %v2552_v53 = vld [vmem:[#allocation26_spill] sm:$0xff] }
  0x77   :  { %1453 = vmatprep.subr.mxu0 %v2051_v12  ;;  %1489 = vmatprep.subr.mxu1 %v2548_v19  ;;  %v2553_v12 = vld [vmem:[#allocation28_spill] sm:$0xff]  ;;  %v2554_v19 = vld [vmem:[#allocation29_spill] sm:$0xff] }
  0x7a   :  { %1454 = vmatpush3.xpose.msra.mxu0 %v2075_v48  ;;  %1490 = vmatpush3.xpose.msra.mxu1 %v2549_v13  ;;  %v2555_v13 = vand.u32 4294901760, %v1710_v21  ;;  %v2559_v21 = vand.u32 4294901760, %v1723_v26  ;;  %v2563_v26 = vand.u32 4294901760, %v1782_v56  ;;  %v2568_v56 = vand.u32 4294901760, %v1841_v38 }
  0x7b   :  { %1455 = vmatprep.subr.mxu0 %v2088_v14  ;;  %1491 = vmatprep.subr.mxu1 %v2550_v7 }
  0x7e   :  { %1456 = vmatpush3.xpose.msra.mxu0 %v2104_v49  ;;  %1492 = vmatpush3.xpose.msra.mxu1 %v2551_v39  ;;  %v2556_v49 = vand.u32 4294901760, %v1715_v23  ;;  %v2561_v23 = vand.u32 4294901760, %v1752_v40  ;;  %v1214_v40 = vld [vmem:[%s2405_s4 + $0x18] sm:$0xff] }
  0x7f   :  { %1457 = vmatprep.subr.mxu0 %v2115_v63  ;;  %1493 = vmatprep.subr.mxu1 %v2552_v53 }
  0x82   :  { %1458 = vmatpush3.xpose.msra.mxu0 %v2129_v42  ;;  %1494 = vmatpush3.xpose.msra.mxu1 %v2553_v12  ;;  %v2557_v42 = vand.u32 4294901760, %v1719_v24  ;;  %v2562_v24 = vld [vmem:[#allocation37_spill] sm:$0xff] }
  0x83   :  { %1495 = vmatprep.subr.mxu1 %v2554_v19  ;;  %1507 = vmatprep.subr.mxu0 %v2555_v13  ;;  %v2558_v19 = vld [vmem:[#allocation33_spill] sm:$0xff] }
  0x85   :  { %1460 = vmatmul.mubr.f32.vlgmr.msra.gmra.mxu0 %v2057_v34  ;;  %v2560_v34 = vand.u32 4294901760, %v1739_v35  ;;  %v2565_v35 = vand.u32 4294901760, %v1799_v0  ;;  %v2572_v0 = vand.u32 4294901760, %v1893_v45 }
  0x86   :  { %1496 = vmatpush3.xpose.msra.mxu1 %v2059_v46  ;;  %1508 = vmatpush3.xpose.msra.mxu0 %v2556_v49  ;;  %v2590_v49 = vld [vmem:[#allocation18_spill] sm:$0xff] }
  0x87   :  { %1461 = vmatprep.mubr.f32.mxu0 %v2118_v41  ;;  %1497 = vmatprep.subr.mxu1 %v2071_v52 }
  0x88   :  { %1509 = vmatprep.subr.mxu0 %v2557_v42  ;;  %v2591_v42 = vand.u32 4294901760, %v2075_v48 }
  0x89   :  { %1462 = vmatmul.mubr.f32.gmra.mxu0 %v2118_v41  ;;  %v2592_v41 = vld [vmem:[#allocation21_spill] sm:$0xff] }
  0x8a   :  { %1498 = vmatpush3.xpose.msra.mxu1 %v2558_v19  ;;  %1510 = vmatpush3.xpose.msra.mxu0 %v2559_v21 }
  0x8b   :  { %1463 = vmatprep.mubr.f32.mxu0 %v2140_v25  ;;  %1511 = vmatprep.subr.mxu0 %v2560_v34 }
  0x8c   :  { %1547 = vmatprep.subr.mxu1 %v1685_v9  ;;  %v2564_v9 = vand.u32 4294901760, %v1786_v58  ;;  %v2570_v58 = vand.u32 4294901760, %v1867_v57 }
  0x8d   :  { %1464 = vmatmul.mubr.f32.gmra.mxu0 %v2140_v25  ;;  %1500 = vmatmul.mubr.f32.vlgmr.msra.gmra.mxu1 %v2066_v36  ;;  %v2588_v36 = vld [vmem:[#allocation31_spill] sm:$0xff]  ;;  %v2593_v25 = vand.u32 4294901760, %v2088_v14  ;;  %v2600_v14 = vld [vmem:[#allocation32_spill] sm:$0xff] }
  0x8e   :  { %1512 = vmatpush3.xpose.msra.mxu0 %v2561_v23  ;;  %1548 = vmatpush3.xpose.msra.mxu1 %v1687_v10  ;;  %v1212_v10 = vld [vmem:[%s2405_s4 + $0x8] sm:$0xff] }
  0x8f   :  { %1465 = vmatprep.mubr.f32.mxu0 %v2159_v4  ;;  %1501 = vmatprep.mubr.f32.mxu1 %v2562_v24 }
  0x90   :  { %1513 = vmatprep.subr.mxu0 %v2563_v26  ;;  %1549 = vmatprep.subr.mxu1 %v1689_v11  ;;  %v1213_v11 = vld [vmem:[%s2405_s4 + $0x10] sm:$0xff] }
  0x91   :  { %1466 = vmatmul.mubr.f32.gmra.mxu0 %v2159_v4  ;;  %1502 = vmatmul.mubr.f32.gmra.mxu1 %v2562_v24  ;;  %v2599_v4 = vld [vmem:[#allocation29_spill] sm:$0xff] }
  0x92   :  { %1514 = vmatpush3.xpose.msra.mxu0 %v2564_v9  ;;  %1550 = vmatpush3.xpose.msra.mxu1 %v1698_v15  ;;  %v2566_v15 = vand.u32 4294901760, %v1812_v8  ;;  %v2578_v8 = vld [vmem:[#allocation20_spill] sm:$0xff] }
  0x93   :  { %1503 = vmatprep.mubr.f32.mxu1 %v2156_v2  ;;  %1515 = vmatprep.subr.mxu0 %v2565_v35 }
  0x94   :  { %1551 = vmatprep.subr.mxu1 %v1707_v20  ;;  %1539 = vmatprep.mubr.f32.mxu0 %v2034_v31  ;;  %v2567_v20 = vand.u32 4294901760, %v1834_v27  ;;  %v2580_v27 = vld [vmem:[#allocation22_spill] sm:$0xff] }
  0x95   :  { %1504 = vmatmul.mubr.f32.gmra.mxu1 %v2156_v2  ;;  %1222 = vperm.xlu1 %1592, %v1212_v10   ;;  %v2581_v38 = vand.u32 4294901760, %v2580_v27  ;;  %v2597_v2 = vld [vmem:[#allocation36_spill] sm:$0xff] }
  0x96   :  { %1516 = vmatpush3.xpose.msra.mxu0 %v2566_v15  ;;  %1552 = vmatpush3.xpose.msra.mxu1 %v1712_v22  ;;  %v2569_v22 = vand.u32 4294901760, %v1858_v51  ;;  %v2582_v51 = vld [vmem:[#allocation24_spill] sm:$0xff]  ;;  %v2598_v48 = vand.u32 4294901760, %v2597_v2 }
  0x97   :  { %1505 = vmatprep.mubr.f32.mxu1 %v2172_v28  ;;  %1517 = vmatprep.subr.mxu0 %v2567_v20  ;;  %v2583_v57 = vand.u32 4294901760, %v2582_v51 }
  0x98   :  { %1553 = vmatprep.subr.mxu1 %v1731_v30  ;;  %1227 = vperm.xlu0 %1591, %v1213_v11   ;;  %v2571_v30 = vand.u32 4294901760, %v1877_v1  ;;  %v2584_v1 = vld [vmem:[#allocation27_spill] sm:$0xff] }
  0x99   :  { %1506 = vmatmul.mubr.f32.gmra.mxu1 %v2172_v28  ;;  %1232 = vperm.xlu1 %1592, %v1214_v40   ;;  %v2585_v45 = vand.u32 4294901760, %v2584_v1  ;;  %v2589_v28 = vand.u32 4294901760, %v2588_v36 }
  0x9a   :  { %1518 = vmatpush3.xpose.msra.mxu0 %v2568_v56  ;;  %1554 = vmatpush3.xpose.msra.mxu1 %v1735_v33  ;;  %v2573_v33 = vand.u32 4294901760, %v1905_v59  ;;  %v2586_v59 = vld [vmem:[#allocation30_spill] sm:$0xff] }
  0x9b   :  { %1519 = vmatprep.subr.mxu0 %v2569_v22  ;;  %1555 = vmatprep.subr.mxu1 %v1761_v43  ;;  %v2574_v43 = vand.u32 4294901760, %v1921_v5  ;;  %v2587_v5 = vand.u32 4294901760, %v2586_v59 }
  0x9c   :  { %1579 = vmatprep.mubr.f32.mxu1 %v2034_v31 }
  0x9e   :  { %1520 = vmatpush3.xpose.msra.mxu0 %v2570_v58  ;;  %1556 = vmatpush3.xpose.msra.mxu1 %v1776_v54  ;;  %v2575_v54 = vand.u32 4294901760, %v2533_v47 }
  0x9f   :  { %1521 = vmatprep.subr.mxu0 %v2571_v30  ;;  %1557 = vmatprep.subr.mxu1 %v1795_v62  ;;  %v2576_v62 = vand.u32 4294901760, %v2535_v18 }
  0xa2   :  { %1522 = vmatpush3.xpose.msra.mxu0 %v2572_v0  ;;  %1558 = vmatpush3.xpose.msra.mxu1 %v1803_v3  ;;  %v2577_v3 = vand.u32 4294901760, %v2537_v37 }
  0xa3   :  { %1523 = vmatprep.subr.mxu0 %v2573_v33  ;;  %1559 = vmatprep.subr.mxu1 %v1821_v16  ;;  %v2579_v16 = vand.u32 4294901760, %v2578_v8 }
  0xa6   :  { %1524 = vmatpush3.xpose.msra.mxu0 %v2574_v43  ;;  %1560 = vmatpush3.xpose.msra.mxu1 %v2532_v55 }
  0xa7   :  { %1525 = vmatprep.subr.mxu0 %v2575_v54  ;;  %1561 = vmatprep.subr.mxu1 %v2534_v61 }
  0xaa   :  { %1526 = vmatpush3.xpose.msra.mxu0 %v2576_v62  ;;  %1562 = vmatpush3.xpose.msra.mxu1 %v2536_v60 }
  0xab   :  { %1527 = vmatprep.subr.mxu0 %v2577_v3  ;;  %1563 = vmatprep.subr.mxu1 %v2538_v32 }
  0xae   :  { %1528 = vmatpush3.xpose.msra.mxu0 %v2579_v16  ;;  %1564 = vmatpush3.xpose.msra.mxu1 %v2540_v6 }
  0xaf   :  { %1529 = vmatprep.subr.mxu0 %v2581_v38  ;;  %1565 = vmatprep.subr.mxu1 %v2542_v17 }
  0xb0   :  { %v74_v15 = vpop.permute.xlu0 %73 }
  0xb2   :  { %1530 = vmatpush3.xpose.msra.mxu0 %v2583_v57  ;;  %1566 = vmatpush3.xpose.msra.mxu1 %v2544_v29 }
  0xb3   :  { %1531 = vmatprep.subr.mxu0 %v2585_v45  ;;  %1567 = vmatprep.subr.mxu1 %v2545_v44  ;;  %v2594_v44 = vld [vmem:[#allocation34_spill] sm:$0xff] }
  0xb4   :  { %v2595_v29 = vand.u32 4294901760, %v2594_v44 }
  0xb6   :  { %1532 = vmatpush3.xpose.msra.mxu0 %v2587_v5  ;;  %1568 = vmatpush3.xpose.msra.mxu1 %v2547_v50  ;;  %v2596_v50 = vand.u32 4294901760, %v2115_v63  ;;  %v2602_v63 = vld [vmem:[#allocation38_spill] sm:$0xff] }
  0xb7   :  { %1533 = vmatprep.subr.mxu0 %v2589_v28  ;;  %1569 = vmatprep.subr.mxu1 %v2590_v49 }
  0xba   :  { %1534 = vmatpush3.xpose.msra.mxu0 %v2591_v42  ;;  %1570 = vmatpush3.xpose.msra.mxu1 %v2592_v41 }
  0xbb   :  { %1535 = vmatprep.subr.mxu0 %v2593_v25  ;;  %1571 = vmatprep.subr.mxu1 %v2550_v7  ;;  %v79_v56 = vpop.permute.xlu0 %78 }
  0xbe   :  { %1536 = vmatpush3.xpose.msra.mxu0 %v2595_v29  ;;  %1572 = vmatpush3.xpose.msra.mxu1 %v2551_v39  ;;  %v2601_v39 = vld [vmem:[#allocation35_spill] sm:$0xff] }
  0xbf   :  { %1537 = vmatprep.subr.mxu0 %v2596_v50  ;;  %1573 = vmatprep.subr.mxu1 %v2552_v53  ;;  %v84_v30 = vpop.permute.xlu1 %83 }
  0xc2   :  { %1538 = vmatpush3.xpose.msra.mxu0 %v2598_v48  ;;  %1574 = vmatpush3.xpose.msra.mxu1 %v2553_v12 }
  0xc3   :  { %1575 = vmatprep.subr.mxu1 %v2599_v4  ;;  %v89_v57 = vpop.permute.xlu1 %88 }
  0xc5   :  { %1540 = vmatmul.mubr.f32.vlgmr.msra.gmra.mxu0 %v2034_v31 }
  0xc6   :  { %1576 = vmatpush3.xpose.msra.mxu1 %v2059_v46  ;;  %1541 = vmatprep.mubr.f32.mxu0 %v2600_v14 }
  0xc7   :  { %1577 = vmatprep.subr.mxu1 %v2071_v52 }
  0xc9   :  { %1542 = vmatmul.mubr.f32.gmra.mxu0 %v2600_v14 }
  0xca   :  { %1578 = vmatpush3.xpose.msra.mxu1 %v2558_v19  ;;  %1543 = vmatprep.mubr.f32.mxu0 %v2601_v39 }
  0xcd   :  { %1544 = vmatmul.mubr.f32.gmra.mxu0 %v2601_v39  ;;  %1580 = vmatmul.mubr.f32.vlgmr.msra.gmra.mxu1 %v2034_v31 }
  0xce   :  { %1545 = vmatprep.mubr.f32.mxu0 %v2602_v63  ;;  %1581 = vmatprep.mubr.f32.mxu1 %v2600_v14 }
  0xd1   :  { %1546 = vmatmul.mubr.f32.gmra.mxu0 %v2602_v63  ;;  %1582 = vmatmul.mubr.f32.gmra.mxu1 %v2600_v14 }
  0xd2   :  { %1583 = vmatprep.mubr.f32.mxu1 %v2601_v39 }
  0xd5   :  { %1584 = vmatmul.mubr.f32.gmra.mxu1 %v2601_v39 }
  0xd6   :  { %1585 = vmatprep.mubr.f32.mxu1 %v2602_v63 }
  0xd9   :  { %1586 = vmatmul.mubr.f32.gmra.mxu1 %v2602_v63 }
 0x105   :  { %v303_v46 = vpop.f32.mrf.mxu0 }
 0x106   :  { %v304_v0 = vadd.f32 %v303_v46, %v74_v15 }
 0x107   :  { %v305_v12 = vpop.f32.mrf.mxu0 }
 0x108   :  { %v306_v54 = vadd.f32 %v305_v12, %v74_v15 }
 0x109   :  { %v314_v52 = vpop.f32.mrf.mxu0 }
 0x10a   :  { %v315_v43 = vadd.f32 %v314_v52, %v79_v56 }
 0x10b   :  { %v316_v53 = vpop.f32.mrf.mxu0 }
 0x10c   :  { %v317_v8 = vadd.f32 %v316_v53, %v79_v56 }
 0x10d   :  { %v568_v31 = vpop.f32.mrf.mxu1  ;;  %v325_v47 = vpop.f32.mrf.mxu0 }
 0x10e   :  { %v569_v16 = vadd.f32 %v568_v31, %v304_v0  ;;  %v326_v51 = vadd.f32 %v325_v47, %v84_v30 }
 0x10f   :  { %v570_v55 = vpop.f32.mrf.mxu1  ;;  %v327_v18 = vpop.f32.mrf.mxu0 }
 0x110   :  { %v571_v1 = vadd.f32 %v570_v55, %v306_v54  ;;  %v328_v28 = vadd.f32 %v327_v18, %v84_v30  ;;  %v1218_v54 = vpop.permute.xlu0 %1217 }
 0x111   :  { %v575_v61 = vpop.f32.mrf.mxu1  ;;  %v336_v37 = vpop.f32.mrf.mxu0 }
 0x112   :  { %v576_v38 = vadd.f32 %v575_v61, %v315_v43  ;;  %v337_v41 = vadd.f32 %v336_v37, %v89_v57 }
 0x113   :  { %v577_v60 = vpop.f32.mrf.mxu1  ;;  %v338_v19 = vpop.f32.mrf.mxu0 }
 0x114   :  { %v578_v36 = vadd.f32 %v577_v60, %v317_v8  ;;  %v339_v4 = vadd.f32 %v338_v19, %v89_v57  ;;  %v1228_v57 = vpop.permute.xlu0 %1227 }
 0x115   :  { %v582_v32 = vpop.f32.mrf.mxu1 }
 0x116   :  { %v583_v50 = vadd.f32 %v582_v32, %v326_v51 }
 0x117   :  { %v584_v6 = vpop.f32.mrf.mxu1 }
 0x118   :  { %v585_v12 = vadd.f32 %v584_v6, %v328_v28 }
 0x119   :  { %v589_v17 = vpop.f32.mrf.mxu1 }
 0x11a   :  { %v590_v55 = vadd.f32 %v589_v17, %v337_v41 }
 0x11b   :  { %v591_v21 = vpop.f32.mrf.mxu1 }
 0x11c   :  { %v592_v32 = vadd.f32 %v591_v21, %v339_v4 }
 0x145   :  { %v726_v13 = vpop.f32.mrf.mxu0 }
 0x146   :  { %v727_v45 = vadd.f32 %v726_v13, %v569_v16  ;;  %v1223_v16 = vpop.permute.xlu1 %1222 }
 0x147   :  { %v728_v7 = vpop.f32.mrf.mxu0 }
 0x148   :  { %v729_v42 = vadd.f32 %v728_v7, %v571_v1 }
 0x149   :  { %v734_v34 = vpop.f32.mrf.mxu0 }
 0x14a   :  { %v735_v49 = vadd.f32 %v734_v34, %v576_v38  ;;  %v1233_v41 = vpop.permute.xlu1 %1232 }
 0x14b   :  { %v736_v24 = vpop.f32.mrf.mxu0 }
 0x14c   :  { %v737_v2 = vadd.f32 %v736_v24, %v578_v36 }
 0x14d   :  { %v856_v23 = vpop.f32.mrf.mxu1  ;;  %v742_v9 = vpop.f32.mrf.mxu0 }
 0x14e   :  { %v857_v25 = vadd.f32 %v856_v23, %v727_v45  ;;  %v743_v52 = vadd.f32 %v742_v9, %v583_v50 }
 0x14f   :  { %v858_v26 = vpop.f32.mrf.mxu1  ;;  %v744_v35 = vpop.f32.mrf.mxu0 }
 0x150   :  { %v859_v14 = vadd.f32 %v858_v26, %v729_v42  ;;  %v745_v60 = vadd.f32 %v744_v35, %v585_v12 }
 0x151   :  { %v865_v10 = vpop.f32.mrf.mxu1  ;;  %v750_v40 = vpop.f32.mrf.mxu0 }
 0x152   :  { %v866_v48 = vadd.f32 %v865_v10, %v735_v49  ;;  %v751_v34 = vadd.f32 %v750_v40, %v590_v55 }
 0x153   :  { %v867_v11 = vpop.f32.mrf.mxu1  ;;  %v752_v22 = vpop.f32.mrf.mxu0 }
 0x154   :  { %v868_v31 = vadd.f32 %v867_v11, %v737_v2  ;;  %v753_v9 = vadd.f32 %v752_v22, %v592_v32 }
 0x155   :  { %v874_v20 = vpop.f32.mrf.mxu1 }
 0x156   :  { %v875_v37 = vadd.f32 %v874_v20, %v743_v52 }
 0x157   :  { %v876_v58 = vpop.f32.mrf.mxu1 }
 0x158   :  { %v877_v26 = vadd.f32 %v876_v58, %v745_v60 }
 0x159   :  { %v883_v62 = vpop.f32.mrf.mxu1 }
 0x15a   :  { %v884_v17 = vadd.f32 %v883_v62, %v751_v34 }
 0x15b   :  { %v885_v59 = vpop.f32.mrf.mxu1 }
 0x15c   :  { %v886_v30 = vadd.f32 %v885_v59, %v753_v9 }
 0x185   :  { %v1051_v33 = vpop.f32.mrf.mxu0 }
 0x186   :  { %v1052_v39 = vadd.f32 %v1051_v33, %v857_v25 }
 0x187   :  { %v1053_v3 = vpop.f32.mrf.mxu0 }
 0x188   :  { %v1054_v47 = vadd.f32 %v1053_v3, %v859_v14 }
 0x189   :  { %v1058_v27 = vpop.f32.mrf.mxu0 }
 0x18a   :  { %v1059_v53 = vadd.f32 %v1058_v27, %v866_v48 }
 0x18b   :  { %v1060_v5 = vpop.f32.mrf.mxu0 }
 0x18c   :  { %v1061_v13 = vadd.f32 %v1060_v5, %v868_v31 }
 0x18d   :  { %v1065_v44 = vpop.f32.mrf.mxu0  ;;  %v1176_v29 = vpop.f32.mrf.mxu1 }
 0x18e   :  { %v1177_v61 = vadd.f32 %v1176_v29, %v1052_v39  ;;  %v1066_v10 = vadd.f32 %v1065_v44, %v875_v37 }
 0x18f   :  { %v1067_v63 = vpop.f32.mrf.mxu0  ;;  %v1178_v46 = vpop.f32.mrf.mxu1 }
 0x190   :  { %v1179_v23 = vadd.f32 %v1178_v46, %v1054_v47  ;;  %v1068_v15 = vadd.f32 %v1067_v63, %v877_v26 }
 0x191   :  { %v1183_v18 = vpop.f32.mrf.mxu1  ;;  %v1072_v19 = vpop.f32.mrf.mxu0 }
 0x192   :  { %v1184_v7 = vadd.f32 %v1183_v18, %v1059_v53  ;;  %v1073_v21 = vadd.f32 %v1072_v19, %v884_v17 }
 0x193   :  { %v1185_v24 = vpop.f32.mrf.mxu1  ;;  %v1074_v35 = vpop.f32.mrf.mxu0 }
 0x194   :  { %1593 = vtanh.f32 %v1184_v7  ;;  %v1186_v6 = vadd.f32 %v1185_v24, %v1061_v13  ;;  %v1075_v33 = vadd.f32 %v1074_v35, %v886_v30  ;;  %v1264_v35 = vld [vmem:[%s2402_s1] sm:$0x3] }
 0x195   :  { %1595 = vtanh.f32 %v1177_v61  ;;  %v1190_v11 = vpop.f32.mrf.mxu1  ;;  %v1261_v61 = vstv %s2406_s5 }
 0x196   :  { %1597 = vtanh.f32 %v1186_v6  ;;  %v1191_v56 = vadd.f32 %v1190_v11, %v1066_v10  ;;  %v1268_v10 = vlaneseq }
 0x197   :  { %1599 = vtanh.f32 %v1179_v23  ;;  %v1192_v20 = vpop.f32.mrf.mxu1 }
 0x198   :  { %1601 = vtanh.f32 %v1191_v56  ;;  %v1193_v40 = vadd.f32 %v1192_v20, %v1068_v15  ;;  %v1269_v17 = vshrl.u32 %v1268_v10, 7 }
 0x199   :  { %v1197_v0 = vpop.f32.mrf.mxu1 }
 0x19a   :  { %1603 = vtanh.f32 %v1193_v40  ;;  %v1198_v58 = vadd.f32 %v1197_v0, %v1073_v21  ;;  %v1270_v56 = vsub.s32 0, %v1269_v17  ;;  %v1274_v20 = vsub.s32 1, %v1269_v17 }
 0x19b   :  { %v1199_v43 = vpop.f32.mrf.mxu1 }
 0x19c   :  { %1605 = vtanh.f32 %v1198_v58  ;;  %v1200_v22 = vadd.f32 %v1199_v43, %v1075_v33  ;;  %v1271_v21 = vrot.slane %v1264_v35, %v1270_v56  ;;  %v1275_v0 = vrot.slane %v1264_v35, %v1274_v20 }
 0x19e   :  { %1607 = vtanh.f32 %v1200_v22 }
 0x1a1   :  { %v1594_v62 = vpop.eup %1593 }
 0x1a2   :  { %v1596_v3 = vpop.eup %1595  ;;  %v1237_v38 = vmul.f32 %v1594_v62, %v1223_v16 }
 0x1a3   :  { %v1598_v8 = vpop.eup %1597  ;;  %v1235_v1 = vmul.f32 %v1596_v3, %v1218_v54 }
 0x1a4   :  { %v1600_v27 = vpop.eup %1599  ;;  %v1238_v45 = vmul.f32 %v1598_v8, %v1223_v16 }
 0x1a5   :  { %v1602_v51 = vpop.eup %1601  ;;  %v1236_v36 = vmul.f32 %v1600_v27, %v1218_v54  ;;  %v1243_v28 = vadd.f32 %v1237_v38, %v1235_v1 }
 0x1a6   :  { %v1239_v59 = vmul.f32 %v1602_v51, %v1228_v57 }
 0x1a7   :  { %v1604_v5 = vpop.eup %1603  ;;  %v1252_v25 = vadd.f32 %v1238_v45, %v1236_v36 }
 0x1a8   :  { %v1240_v49 = vmul.f32 %v1604_v5, %v1228_v57  ;;  %v1244_v44 = vadd.f32 %v1243_v28, %v1239_v59 }
 0x1a9   :  { %v1606_v42 = vpop.eup %1605 }
 0x1aa   :  { %v1241_v29 = vmul.f32 %v1606_v42, %v1233_v41  ;;  %v1253_v2 = vadd.f32 %v1252_v25, %v1240_v49 }
 0x1ab   :  { %v1608_v50 = vpop.eup %1607 }
 0x1ac   :  { %v1245_v48 = vadd.f32 %v1244_v44, %v1241_v29  ;;  %v1242_v4 = vmul.f32 %v1608_v50, %v1233_v41 }
 0x1ae   :  { %v1246_v14 = vrot.slane %v1245_v48, 4  ;;  %v1254_v39 = vadd.f32 %v1253_v2, %v1242_v4 }
 0x1b0   :  { %v1255_v63 = vrot.slane %v1254_v39, 4  ;;  %v1247_v46 = vadd.f32 %v1246_v14, %v1245_v48 }
 0x1b2   :  { %v1248_v12 = vrot.slane %v1247_v46, 2  ;;  %v1256_v52 = vadd.f32 %v1255_v63, %v1254_v39 }
 0x1b4   :  { %v1249_v31 = vadd.f32 %v1248_v12, %v1247_v46  ;;  %v1257_v53 = vrot.slane %v1256_v52, 2 }
 0x1b6   :  { %v1250_v55 = vrot.slane %v1249_v31, 1  ;;  %v1258_v47 = vadd.f32 %v1257_v53, %v1256_v52 }
 0x1b8   :  { %v1251_v18 = vadd.f32 %v1250_v55, %v1249_v31  ;;  %v1259_v60 = vrot.slane %v1258_v47, 1 }
 0x1ba   :  { %v1260_v37 = vadd.f32 %v1259_v60, %v1258_v47  ;;  %v1262_v13 = vadd.f32 %v1261_v61, %v1251_v18 }
 0x1bc   :  { %v1263_v7 = vadd.f32 %v1261_v61, %v1260_v37  ;;  %v1282_v32 = vand.u32 2147483647, %v1262_v13  ;;  %v1265_v58 = vmax.f32 %v1262_v13, 0.0  ;;  %v1278_v43 = vmul.f32 %v1271_v21, %v1262_v13 }
 0x1be   :  { %v1283_v34 = vand.u32 2147483647, %v1263_v7  ;;  %v1284_v23 = vsub.f32 0.0, %v1282_v32  ;;  %v1266_v62 = vmax.f32 %v1263_v7, 0.0  ;;  %v1279_v3 = vmul.f32 %v1275_v0, %v1263_v7 }
 0x1bf   :  { %v1280_v57 = vsub.f32 %v1265_v58, %v1278_v43 }
 0x1c0   :  { %v1285_v19 = vsub.f32 0.0, %v1283_v34  ;;  %v1286_v24 = vmul.f32 1.442695, %v1284_v23  ;;  %v1281_v59 = vsub.f32 %v1266_v62, %v1279_v3 }
 0x1c2   :  { %v1288_v26 = vmul.f32 1.442695, %v1285_v19  ;;  %1609 = vpow2.f32 %v1286_v24 }
 0x1c4   :  { %1611 = vpow2.f32 %v1288_v26 }
 0x1cf   :  { %v1610_v6 = vpop.eup %1609 }
 0x1d0   :  { %v1290_v11 = vadd.f32 1.0, %v1610_v6  ;;  %v1293_v30 = vmul.f32 -0.5, %v1610_v6  ;;  %v1296_v22 = vand.u32 2147483647, %v1610_v6 }
 0x1d1   :  { %v1612_v9 = vpop.eup %1611 }
 0x1d2   :  { %v1299_v15 = vadd.f32 1.0, %v1612_v9  ;;  %1613 = vlog2.f32 %v1290_v11  ;;  %v1302_v40 = vmul.f32 -0.5, %v1612_v9  ;;  %v1294_v33 = vadd.f32 1.0, %v1293_v30 }
 0x1d3   :  { %v1305_v8 = vand.u32 2147483647, %v1612_v9  ;;  %vm1297_vm1 = vcmp.lt.f32.partialorder %v1296_v22, 0.0004427343 }
 0x1d4   :  { %1615 = vlog2.f32 %v1299_v15  ;;  %v1303_v54 = vadd.f32 1.0, %v1302_v40  ;;  %v1295_v51 = vmul.f32 %v1610_v6, %v1294_v33 }
 0x1d5   :  { %vm1306_vm2 = vcmp.lt.f32.partialorder %v1305_v8, 0.0004427343 }
 0x1d6   :  { %v1304_v45 = vmul.f32 %v1612_v9, %v1303_v54 }
 0x1df   :  { %v1614_v16 = vpop.eup %1613 }
 0x1e0   :  { %v1292_v38 = vmul.f32 0.6931472, %v1614_v16 }
 0x1e1   :  { %v1616_v27 = vpop.eup %1615 }
 0x1e2   :  { %v1301_v1 = vmul.f32 0.6931472, %v1616_v27  ;;  %v1298_v5 = vsel %vm1297_vm1, %v1295_v51, %v1292_v38 }
 0x1e3   :  { %v1308_v28 = vadd.f32 %v1298_v5, %v1280_v57 }
 0x1e4   :  { %v1307_v36 = vsel %vm1306_vm2, %v1304_v45, %v1301_v1 }
 0x1e5   :  { %v1309_v49 = vadd.f32 %v1307_v36, %v1281_v59  ;;  %v1312_v42 = vsel %vm1311_vm3, %v1308_v28, 0.0 }
 0x1e7   :  { %v1313_v41 = vsel %vm1311_vm3, %v1309_v49, 0.0 }
 0x1e8   :  { %v1314_v25 = vadd.f32 %v1313_v41, %v1312_v42 }
 0x1ea   :  { %1315 = vadd.xlane.f32.xlu0 %v1314_v25 }
 0x273   :  { %v1316_v44 = vpop.xlane.xlu0 %1315 }
 0x274   :  { %v1317_v29 = vrot.slane %v1316_v44, 4 }
 0x276   :  { %v1318_v50 = vadd.f32 %v1317_v29, %v1316_v44 }
 0x278   :  { %v1319_v2 = vrot.slane %v1318_v50, 2 }
 0x27a   :  { %v1320_v48 = vadd.f32 %v1319_v2, %v1318_v50 }
 0x27c   :  { %v1321_v4 = vrot.slane %v1320_v48, 1 }
 0x27e   :  { %v1322_v14 = vadd.f32 %v1321_v4, %v1320_v48 }
 0x280   :  { %1587 = vpush %v1322_v14 }
 0x2b1   :  { %s1588_s1 = spop %1587 }
 0x2b2   :  { %s1331_s12 = smul.f32 0.00390625, %s1588_s1 }
 0x2b4   :  { %1333 = sst [smem:[#allocation4]] %s1331_s12 }
 0x2b5   :  { %1341 = dma.smem_to_hbm %s1628_s13, 16, %s2407_s6, [#allocation5]  }
 0x2b6   :  { %1625 = dma.done.wait [#allocation5], 16  }
 0x2b7   :  { %1626 = vsyncadd [#allocation5], 4294967280 }
 0x2b8   :  { %1345 = sfence }
 0x2b9   :  { %1346 = vsyncpa [#allocation5], 1 }

</bundles_post_ra>
